<compile_context>
chip_gen: v6e
topology: v6e:2x2x1
jax: 0.10.0
libtpu: 0.0.40
codegen_flags: <defaults>
</compile_context>

<pallas_src>
import functools

import jax
import jax.numpy as jnp
from jax.experimental import pallas as pl
from jax.experimental.pallas import tpu as pltpu

BN_EPS = 1e-5
LANE = 128                              # lane width (last-dim tiling)
SUBLANE = 8                             # f32 sublane count (second-to-last dim tiling)
VMEM_LIMIT_BYTES = 32 * 1024 * 1024     # explicit scoped-VMEM budget (v5e .. v7x safe)


def _round_up(n, m):
    return ((n + m - 1) // m) * m


def _pad2(a, rows, cols):
    return jnp.pad(a, ((0, rows - a.shape[0]), (0, cols - a.shape[1])))


def _pick_tile(dim_padded, preferred):
    t = min(preferred, dim_padded)
    if dim_padded % t != 0:
        t = LANE          # dim_padded is always a multiple of 128 by construction
    return t


def _linear_bn_relu_kernel(n_rows, x_ref, w_ref, b_ref, g_ref, bt_ref, o_ref, acc_ref):
    """One (B_pad, TILE_N) output tile of Linear -> BatchNorm1d(train) -> ReLU.

    Grid: (j over N tiles [parallel], k over K tiles [arbitrary / reduction]).
    acc_ref: per-tile f32 VMEM accumulator living across the k axis.
    """
    k = pl.program_id(1)

    @pl.when(k == 0)
    def _():
        acc_ref[...] = jnp.zeros_like(acc_ref)

    a = x_ref[...].astype(w_ref.dtype)        # bf16 (or f32) MXU operand
    acc_ref[...] += jnp.dot(a, w_ref[...], preferred_element_type=jnp.float32)

    @pl.when(k == pl.num_programs(1) - 1)
    def _():
        h = acc_ref[...] + b_ref[...]                              # (B_pad, TILE_N), f32
        rows = jax.lax.broadcasted_iota(jnp.int32, h.shape, 0)
        row_mask = rows < n_rows                                   # exclude padded batch rows
        inv_n = jnp.float32(1.0 / n_rows)
        hm = jnp.where(row_mask, h, 0.0)
        mean = jnp.sum(hm, axis=0, keepdims=True) * inv_n
        d = jnp.where(row_mask, h - mean, 0.0)
        var = jnp.sum(d * d, axis=0, keepdims=True) * inv_n        # biased variance (train mode)
        scale = g_ref[...] * jax.lax.rsqrt(var + BN_EPS)           # rsqrt -> EUP slot
        shift = bt_ref[...] - mean * scale
        y = jnp.maximum(h * scale + shift, 0.0)                    # folded BN + ReLU epilogue
        y = jnp.where(row_mask, y, 0.0)                            # keep padded rows exactly zero
        o_ref[...] = y.astype(o_ref.dtype)


def _linear_kernel(x_ref, w_ref, b_ref, o_ref, acc_ref):
    """Final Linear layer (no BN / ReLU)."""
    k = pl.program_id(1)

    @pl.when(k == 0)
    def _():
        acc_ref[...] = jnp.zeros_like(acc_ref)

    a = x_ref[...].astype(w_ref.dtype)
    acc_ref[...] += jnp.dot(a, w_ref[...], preferred_element_type=jnp.float32)

    @pl.when(k == pl.num_programs(1) - 1)
    def _():
        o_ref[...] = (acc_ref[...] + b_ref[...]).astype(o_ref.dtype)


def _layer_call(kernel, x_pad, w_pad, vecs, *, tile_n, tile_k, transcendentals):
    B_pad, K_pad = x_pad.shape
    _, N_pad = w_pad.shape
    tn = _pick_tile(N_pad, tile_n)
    tk = _pick_tile(K_pad, tile_k)
    grid = (N_pad // tn, K_pad // tk)

    in_specs = [
        pl.BlockSpec((B_pad, tk), lambda j, k: (0, k)),     # activations: full batch, K tile
        pl.BlockSpec((tk, tn), lambda j, k: (k, j)),        # weight slab (auto double-buffered)
    ] + [pl.BlockSpec((1, tn), lambda j, k: (0, j)) for _ in vecs]
    out_spec = pl.BlockSpec((B_pad, tn), lambda j, k: (0, j))

    bytes_accessed = (
        x_pad.size * x_pad.dtype.itemsize
        + w_pad.size * w_pad.dtype.itemsize
        + sum(v.size * v.dtype.itemsize for v in vecs)
        + B_pad * N_pad * 4
    )
    cost = pl.CostEstimate(
        flops=2 * B_pad * K_pad * N_pad,
        transcendentals=transcendentals,
        bytes_accessed=bytes_accessed,
    )

    return pl.pallas_call(
        kernel,
        out_shape=jax.ShapeDtypeStruct((B_pad, N_pad), jnp.float32),
        grid_spec=pltpu.PrefetchScalarGridSpec(
            num_scalar_prefetch=0,
            grid=grid,
            in_specs=in_specs,
            out_specs=out_spec,
            scratch_shapes=[pltpu.VMEM((B_pad, tn), jnp.float32)],
        ),
        compiler_params=pltpu.CompilerParams(
            dimension_semantics=("parallel", "arbitrary"),
            vmem_limit_bytes=VMEM_LIMIT_BYTES,
        ),
        cost_estimate=cost,
    )(x_pad, w_pad, *vecs)


def mlp_forward(x, params, num_hidden_layers, *, compute_dtype=jnp.bfloat16,
                tile_n=256, tile_k=512):
    """x: (B, input_dim) float32.
    params: flat list [w1, b1, gamma1, beta1, ..., w_out, b_out] (unpadded), with w already
    transposed to (d_in, d_out) and the per-feature vectors shaped (1, d)."""
    B, d_in = x.shape
    B_pad = _round_up(max(B, SUBLANE), SUBLANE)

    h = _pad2(x.astype(jnp.float32), B_pad, _round_up(d_in, LANE))

    idx = 0
    for _ in range(num_hidden_layers):
        w, b, g, bt = params[idx], params[idx + 1], params[idx + 2], params[idx + 3]
        idx += 4
        K_pad = h.shape[1]
        N_pad = _round_up(w.shape[1], LANE)
        w_p = _pad2(w, K_pad, N_pad).astype(compute_dtype)
        vecs = [_pad2(v.astype(jnp.float32), 1, N_pad) for v in (b, g, bt)]
        kern = functools.partial(_linear_bn_relu_kernel, B)
        h = _layer_call(kern, h, w_p, vecs, tile_n=tile_n, tile_k=tile_k,
                        transcendentals=N_pad)

    w, b = params[idx], params[idx + 1]
    K_pad = h.shape[1]
    out_dim = w.shape[1]
    N_pad = _round_up(out_dim, LANE)
    w_p = _pad2(w, K_pad, N_pad).astype(compute_dtype)
    b_p = _pad2(b.astype(jnp.float32), 1, N_pad)
    y = _layer_call(_linear_kernel, h, w_p, [b_p], tile_n=tile_n, tile_k=tile_k,
                    transcendentals=0)
    return y[:B, :out_dim]


def init_mlp_params(key, input_dim, hidden_dim, output_dim, num_hidden_layers):
    """Deterministic init. Linear weights ~ PyTorch's U(-1/sqrt(fan_in), 1/sqrt(fan_in)).
    Returns flat list: [w1, b1, gamma1, beta1, ..., w_out, b_out] with w transposed to
    (d_in, d_out) and 1-D vectors reshaped to (1, d)."""
    params = []
    d_in = input_dim
    for _ in range(num_hidden_layers):
        key, kw, kb, kg, kbe = jax.random.split(key, 5)
        bound = 1.0 / jnp.sqrt(d_in)
        w = jax.random.uniform(kw, (d_in, hidden_dim), jnp.float32, -bound, bound)
        b = jax.random.uniform(kb, (1, hidden_dim), jnp.float32, -bound, bound)
        # Non-trivial affine BN params (PyTorch default is gamma=1, beta=0; perturb for a stricter test).
        gamma = 1.0 + 0.1 * jax.random.normal(kg, (1, hidden_dim), jnp.float32)
        beta = 0.1 * jax.random.normal(kbe, (1, hidden_dim), jnp.float32)
        params += [w, b, gamma, beta]
        d_in = hidden_dim
    key, kw, kb = jax.random.split(key, 3)
    bound = 1.0 / jnp.sqrt(d_in)
    w_out = jax.random.uniform(kw, (d_in, output_dim), jnp.float32, -bound, bound)
    b_out = jax.random.uniform(kb, (1, output_dim), jnp.float32, -bound, bound)
    params += [w_out, b_out]
    return params


def mlp_reference(x, params, num_hidden_layers, matmul_dtype=jnp.float32):
    """Pure-JAX reference. matmul_dtype mirrors the kernel's MXU operand dtype."""
    def mm(a, w):
        return jnp.dot(a.astype(matmul_dtype), w.astype(matmul_dtype),
                       preferred_element_type=jnp.float32,
                       precision=jax.lax.Precision.HIGHEST)

    h = x.astype(jnp.float32)
    idx = 0
    for _ in range(num_hidden_layers):
        w, b, g, bt = params[idx], params[idx + 1], params[idx + 2], params[idx + 3]
        idx += 4
        h = mm(h, w) + b
        mean = jnp.mean(h, axis=0, keepdims=True)
        var = jnp.mean((h - mean) ** 2, axis=0, keepdims=True)
        h = jnp.maximum((h - mean) * jax.lax.rsqrt(var + BN_EPS) * g + bt, 0.0)
    return mm(h, params[idx]) + params[idx + 1]


if __name__ == "__main__":
    # Small shapes consistent with the module's forward: x is (batch, input_dim).
    # batch deliberately not a multiple of 8 to exercise batch padding + BN row masking.
    batch = 12
    input_dim = 16
    hidden_dim = 32
    output_dim = 8
    num_hidden_layers = 2

    key = jax.random.PRNGKey(0)
    key, kx = jax.random.split(key)
    x = jax.random.normal(kx, (batch, input_dim), jnp.float32)
    params = init_mlp_params(key, input_dim, hidden_dim, output_dim, num_hidden_layers)

    # bf16 MXU path (default, fast): compare against a reference that uses the same matmul dtype.
    fwd_bf16 = jax.jit(functools.partial(mlp_forward, num_hidden_layers=num_hidden_layers))
    y = jax.block_until_ready(fwd_bf16(x, params))
    assert y.shape == (batch, output_dim)
    y_ref_bf16 = mlp_reference(x, params, num_hidden_layers, matmul_dtype=jnp.bfloat16)
    assert jnp.allclose(y, y_ref_bf16, atol=2e-3, rtol=2e-3), "Pallas MLP (bf16 path) mismatch"

    # f32 compute path: reproduces the exact PyTorch-f32 forward semantics.
    fwd_f32 = jax.jit(functools.partial(mlp_forward, num_hidden_layers=num_hidden_layers,
                                        compute_dtype=jnp.float32))
    y32 = jax.block_until_ready(fwd_f32(x, params))
    y_ref_f32 = mlp_reference(x, params, num_hidden_layers, matmul_dtype=jnp.float32)
    assert jnp.allclose(y32, y_ref_f32, atol=1e-3, rtol=1e-3), "Pallas MLP (f32 path) mismatch"

    print("KERNEL_OK")
</pallas_src>

<mosaic_0001>
module attributes {stable_mosaic.version = 11 : i64} {
  func.func @_linear_bn_relu_kernel(%arg0: i32, %arg1: i32, %arg2: memref<16x128xf32, #tpu.memory_space<vmem>>, %arg3: memref<128x128xbf16, #tpu.memory_space<vmem>>, %arg4: memref<1x128xf32, #tpu.memory_space<vmem>>, %arg5: memref<1x128xf32, #tpu.memory_space<vmem>>, %arg6: memref<1x128xf32, #tpu.memory_space<vmem>>, %arg7: memref<16x128xf32, #tpu.memory_space<vmem>>, %arg8: memref<16x128xf32, #tpu.memory_space<vmem>>) attributes {dimension_semantics = [#tpu.dimension_semantics<parallel>, #tpu.dimension_semantics<arbitrary>], iteration_bounds = array<i64: 1, 1>, scalar_prefetch = 0 : i64, scratch_operands = 1 : i64, tpu.core_type = #tpu.core_type<tc>, window_params = [{transform_indices = @transform_0, window_bounds = array<i64: 16, 128>}, {transform_indices = @transform_1, window_bounds = array<i64: 128, 128>}, {transform_indices = @transform_2, window_bounds = array<i64: 1, 128>}, {transform_indices = @transform_3, window_bounds = array<i64: 1, 128>}, {transform_indices = @transform_4, window_bounds = array<i64: 1, 128>}, {transform_indices = @transform_5, window_bounds = array<i64: 16, 128>}]} {
    %c0_i32 = arith.constant 0 : i32
    %0 = arith.cmpi eq, %arg1, %c0_i32 : i32
    %1 = arith.extui %0 : i1 to i32
    %c0_i32_0 = arith.constant 0 : i32
    %2 = arith.cmpi ne, %1, %c0_i32_0 : i32
    scf.if %2 {
      %cst_10 = arith.constant 0.000000e+00 : f32
      %13 = vector.broadcast %cst_10 : f32 to vector<16x128xf32>
      %c0_11 = arith.constant 0 : index
      %c0_12 = arith.constant 0 : index
      %14 = vector.load %arg8[%c0_11, %c0_12] : memref<16x128xf32, #tpu.memory_space<vmem>>, vector<16x128xf32>
      tpu.vector_store %arg8[%c0_11, %c0_12], %13 {strides = array<i32>} : memref<16x128xf32, #tpu.memory_space<vmem>>, vector<16x128xf32>,
    } else {
    }
    %c0 = arith.constant 0 : index
    %c0_1 = arith.constant 0 : index
    %3 = vector.load %arg2[%c0, %c0_1] : memref<16x128xf32, #tpu.memory_space<vmem>>, vector<16x128xf32>
    %4 = arith.truncf %3 : vector<16x128xf32> to vector<16x128xbf16>
    %c0_2 = arith.constant 0 : index
    %c0_3 = arith.constant 0 : index
    %5 = vector.load %arg8[%c0_2, %c0_3] : memref<16x128xf32, #tpu.memory_space<vmem>>, vector<16x128xf32>
    %c0_4 = arith.constant 0 : index
    %c0_5 = arith.constant 0 : index
    %6 = vector.load %arg3[%c0_4, %c0_5] : memref<128x128xbf16, #tpu.memory_space<vmem>>, vector<128x128xbf16>
    %cst = arith.constant dense<0.000000e+00> : vector<16x128xf32>
    %7 = tpu.matmul %4, %6, %cst {dimension_numbers = #tpu.dot_dimension_numbers<[1], [0], [0], [1], [0, 0, 1, 1], [], []>} : vector<16x128xbf16>, vector<128x128xbf16>, vector<16x128xf32> -> vector<16x128xf32>
    %8 = arith.addf %5, %7 : vector<16x128xf32>
    %c0_6 = arith.constant 0 : index
    %c0_7 = arith.constant 0 : index
    %9 = vector.load %arg8[%c0_6, %c0_7] : memref<16x128xf32, #tpu.memory_space<vmem>>, vector<16x128xf32>
    tpu.vector_store %arg8[%c0_6, %c0_7], %8 {strides = array<i32>} : memref<16x128xf32, #tpu.memory_space<vmem>>, vector<16x128xf32>,
    %c0_i32_8 = arith.constant 0 : i32
    %10 = arith.cmpi eq, %arg1, %c0_i32_8 : i32
    %11 = arith.extui %10 : i1 to i32
    %c0_i32_9 = arith.constant 0 : i32
    %12 = arith.cmpi ne, %11, %c0_i32_9 : i32
    scf.if %12 {
      %c0_10 = arith.constant 0 : index
      %c0_11 = arith.constant 0 : index
      %13 = vector.load %arg8[%c0_10, %c0_11] : memref<16x128xf32, #tpu.memory_space<vmem>>, vector<16x128xf32>
      %c0_12 = arith.constant 0 : index
      %c0_13 = arith.constant 0 : index
      %14 = vector.load %arg4[%c0_12, %c0_13] : memref<1x128xf32, #tpu.memory_space<vmem>>, vector<1x128xf32>
      %15 = vector.broadcast %14 : vector<1x128xf32> to vector<16x128xf32>
      %16 = arith.addf %13, %15 : vector<16x128xf32>
      %17 = tpu.iota {dimensions = array<i32: 0>} : vector<16x128xi32>
      %c12_i32 = arith.constant 12 : i32
      %18 = vector.broadcast %c12_i32 : i32 to vector<16x128xi32>
      %19 = arith.cmpi slt, %17, %18 : vector<16x128xi32>
      %cst_14 = arith.constant 0.000000e+00 : f32
      %20 = vector.broadcast %cst_14 : f32 to vector<16x128xf32>
      %21 = arith.select %19, %16, %20 : vector<16x128xi1>, vector<16x128xf32>
      %cst_15 = arith.constant dense<0.000000e+00> : vector<128xf32>
      %22 = vector.multi_reduction <add>, %21, %cst_15 [0] : vector<16x128xf32> to vector<128xf32>
      %23 = vector.shape_cast %22 : vector<128xf32> to vector<1x128xf32>
      %cst_16 = arith.constant 0.0833333358 : f32
      %24 = vector.broadcast %cst_16 : f32 to vector<1x128xf32>
      %25 = arith.mulf %23, %24 : vector<1x128xf32>
      %26 = vector.broadcast %25 : vector<1x128xf32> to vector<16x128xf32>
      %27 = arith.subf %16, %26 : vector<16x128xf32>
      %cst_17 = arith.constant 0.000000e+00 : f32
      %28 = vector.broadcast %cst_17 : f32 to vector<16x128xf32>
      %29 = arith.select %19, %27, %28 : vector<16x128xi1>, vector<16x128xf32>
      %30 = arith.mulf %29, %29 : vector<16x128xf32>
      %cst_18 = arith.constant dense<0.000000e+00> : vector<128xf32>
      %31 = vector.multi_reduction <add>, %30, %cst_18 [0] : vector<16x128xf32> to vector<128xf32>
      %32 = vector.shape_cast %31 : vector<128xf32> to vector<1x128xf32>
      %cst_19 = arith.constant 0.0833333358 : f32
      %33 = vector.broadcast %cst_19 : f32 to vector<1x128xf32>
      %34 = arith.mulf %32, %33 : vector<1x128xf32>
      %c0_20 = arith.constant 0 : index
      %c0_21 = arith.constant 0 : index
      %35 = vector.load %arg5[%c0_20, %c0_21] : memref<1x128xf32, #tpu.memory_space<vmem>>, vector<1x128xf32>
      %cst_22 = arith.constant 9.99999974E-6 : f32
      %36 = vector.broadcast %cst_22 : f32 to vector<1x128xf32>
      %37 = arith.addf %34, %36 : vector<1x128xf32>
      %38 = math.rsqrt %37 : vector<1x128xf32>
      %39 = arith.mulf %35, %38 : vector<1x128xf32>
      %c0_23 = arith.constant 0 : index
      %c0_24 = arith.constant 0 : index
      %40 = vector.load %arg6[%c0_23, %c0_24] : memref<1x128xf32, #tpu.memory_space<vmem>>, vector<1x128xf32>
      %41 = arith.mulf %25, %39 : vector<1x128xf32>
      %42 = arith.subf %40, %41 : vector<1x128xf32>
      %43 = vector.broadcast %39 : vector<1x128xf32> to vector<16x128xf32>
      %44 = arith.mulf %16, %43 : vector<16x128xf32>
      %45 = vector.broadcast %42 : vector<1x128xf32> to vector<16x128xf32>
      %46 = arith.addf %44, %45 : vector<16x128xf32>
      %cst_25 = arith.constant 0.000000e+00 : f32
      %47 = vector.broadcast %cst_25 : f32 to vector<16x128xf32>
      %48 = arith.maximumf %46, %47 : vector<16x128xf32>
      %cst_26 = arith.constant 0.000000e+00 : f32
      %49 = vector.broadcast %cst_26 : f32 to vector<16x128xf32>
      %50 = arith.select %19, %48, %49 : vector<16x128xi1>, vector<16x128xf32>
      %c0_27 = arith.constant 0 : index
      %c0_28 = arith.constant 0 : index
      %51 = vector.load %arg7[%c0_27, %c0_28] : memref<16x128xf32, #tpu.memory_space<vmem>>, vector<16x128xf32>
      tpu.vector_store %arg7[%c0_27, %c0_28], %50 {strides = array<i32>} : memref<16x128xf32, #tpu.memory_space<vmem>>, vector<16x128xf32>,
    } else {
    }
    return
  }
  func.func @transform_0(%arg0: i32, %arg1: i32) -> (i32, i32) {
    %c0_i32 = arith.constant 0 : i32
    %c0_i32_0 = arith.constant 0 : i32
    return %c0_i32, %arg1 : i32, i32
  }
  func.func @transform_1(%arg0: i32, %arg1: i32) -> (i32, i32) {
    %c0_i32 = arith.constant 0 : i32
    return %arg1, %arg0 : i32, i32
  }
  func.func @transform_2(%arg0: i32, %arg1: i32) -> (i32, i32) {
    %c0_i32 = arith.constant 0 : i32
    %c0_i32_0 = arith.constant 0 : i32
    return %c0_i32, %arg0 : i32, i32
  }
  func.func @transform_3(%arg0: i32, %arg1: i32) -> (i32, i32) {
    %c0_i32 = arith.constant 0 : i32
    %c0_i32_0 = arith.constant 0 : i32
    return %c0_i32, %arg0 : i32, i32
  }
  func.func @transform_4(%arg0: i32, %arg1: i32) -> (i32, i32) {
    %c0_i32 = arith.constant 0 : i32
    %c0_i32_0 = arith.constant 0 : i32
    return %c0_i32, %arg0 : i32, i32
  }
  func.func @transform_5(%arg0: i32, %arg1: i32) -> (i32, i32) {
    %c0_i32 = arith.constant 0 : i32
    %c0_i32_0 = arith.constant 0 : i32
    return %c0_i32, %arg0 : i32, i32
  }
}

module attributes {stable_mosaic.version = 11 : i64} {
  func.func @_linear_kernel(%arg0: i32, %arg1: i32, %arg2: memref<16x128xf32, #tpu.memory_space<vmem>>, %arg3: memref<128x128xbf16, #tpu.memory_space<vmem>>, %arg4: memref<1x128xf32, #tpu.memory_space<vmem>>, %arg5: memref<16x128xf32, #tpu.memory_space<vmem>>, %arg6: memref<16x128xf32, #tpu.memory_space<vmem>>) attributes {dimension_semantics = [#tpu.dimension_semantics<parallel>, #tpu.dimension_semantics<arbitrary>], iteration_bounds = array<i64: 1, 1>, scalar_prefetch = 0 : i64, scratch_operands = 1 : i64, tpu.core_type = #tpu.core_type<tc>, window_params = [{transform_indices = @transform_0, window_bounds = array<i64: 16, 128>}, {transform_indices = @transform_1, window_bounds = array<i64: 128, 128>}, {transform_indices = @transform_2, window_bounds = array<i64: 1, 128>}, {transform_indices = @transform_3, window_bounds = array<i64: 16, 128>}]} {
    %c0_i32 = arith.constant 0 : i32
    %0 = arith.cmpi eq, %arg1, %c0_i32 : i32
    %1 = arith.extui %0 : i1 to i32
    %c0_i32_0 = arith.constant 0 : i32
    %2 = arith.cmpi ne, %1, %c0_i32_0 : i32
    scf.if %2 {
      %cst_10 = arith.constant 0.000000e+00 : f32
      %13 = vector.broadcast %cst_10 : f32 to vector<16x128xf32>
      %c0_11 = arith.constant 0 : index
      %c0_12 = arith.constant 0 : index
      %14 = vector.load %arg6[%c0_11, %c0_12] : memref<16x128xf32, #tpu.memory_space<vmem>>, vector<16x128xf32>
      tpu.vector_store %arg6[%c0_11, %c0_12], %13 {strides = array<i32>} : memref<16x128xf32, #tpu.memory_space<vmem>>, vector<16x128xf32>,
    } else {
    }
    %c0 = arith.constant 0 : index
    %c0_1 = arith.constant 0 : index
    %3 = vector.load %arg2[%c0, %c0_1] : memref<16x128xf32, #tpu.memory_space<vmem>>, vector<16x128xf32>
    %4 = arith.truncf %3 : vector<16x128xf32> to vector<16x128xbf16>
    %c0_2 = arith.constant 0 : index
    %c0_3 = arith.constant 0 : index
    %5 = vector.load %arg6[%c0_2, %c0_3] : memref<16x128xf32, #tpu.memory_space<vmem>>, vector<16x128xf32>
    %c0_4 = arith.constant 0 : index
    %c0_5 = arith.constant 0 : index
    %6 = vector.load %arg3[%c0_4, %c0_5] : memref<128x128xbf16, #tpu.memory_space<vmem>>, vector<128x128xbf16>
    %cst = arith.constant dense<0.000000e+00> : vector<16x128xf32>
    %7 = tpu.matmul %4, %6, %cst {dimension_numbers = #tpu.dot_dimension_numbers<[1], [0], [0], [1], [0, 0, 1, 1], [], []>} : vector<16x128xbf16>, vector<128x128xbf16>, vector<16x128xf32> -> vector<16x128xf32>
    %8 = arith.addf %5, %7 : vector<16x128xf32>
    %c0_6 = arith.constant 0 : index
    %c0_7 = arith.constant 0 : index
    %9 = vector.load %arg6[%c0_6, %c0_7] : memref<16x128xf32, #tpu.memory_space<vmem>>, vector<16x128xf32>
    tpu.vector_store %arg6[%c0_6, %c0_7], %8 {strides = array<i32>} : memref<16x128xf32, #tpu.memory_space<vmem>>, vector<16x128xf32>,
    %c0_i32_8 = arith.constant 0 : i32
    %10 = arith.cmpi eq, %arg1, %c0_i32_8 : i32
    %11 = arith.extui %10 : i1 to i32
    %c0_i32_9 = arith.constant 0 : i32
    %12 = arith.cmpi ne, %11, %c0_i32_9 : i32
    scf.if %12 {
      %c0_10 = arith.constant 0 : index
      %c0_11 = arith.constant 0 : index
      %13 = vector.load %arg6[%c0_10, %c0_11] : memref<16x128xf32, #tpu.memory_space<vmem>>, vector<16x128xf32>
      %c0_12 = arith.constant 0 : index
      %c0_13 = arith.constant 0 : index
      %14 = vector.load %arg4[%c0_12, %c0_13] : memref<1x128xf32, #tpu.memory_space<vmem>>, vector<1x128xf32>
      %15 = vector.broadcast %14 : vector<1x128xf32> to vector<16x128xf32>
      %16 = arith.addf %13, %15 : vector<16x128xf32>
      %c0_14 = arith.constant 0 : index
      %c0_15 = arith.constant 0 : index
      %17 = vector.load %arg5[%c0_14, %c0_15] : memref<16x128xf32, #tpu.memory_space<vmem>>, vector<16x128xf32>
      tpu.vector_store %arg5[%c0_14, %c0_15], %16 {strides = array<i32>} : memref<16x128xf32, #tpu.memory_space<vmem>>, vector<16x128xf32>,
    } else {
    }
    return
  }
  func.func @transform_0(%arg0: i32, %arg1: i32) -> (i32, i32) {
    %c0_i32 = arith.constant 0 : i32
    %c0_i32_0 = arith.constant 0 : i32
    return %c0_i32, %arg1 : i32, i32
  }
  func.func @transform_1(%arg0: i32, %arg1: i32) -> (i32, i32) {
    %c0_i32 = arith.constant 0 : i32
    return %arg1, %arg0 : i32, i32
  }
  func.func @transform_2(%arg0: i32, %arg1: i32) -> (i32, i32) {
    %c0_i32 = arith.constant 0 : i32
    %c0_i32_0 = arith.constant 0 : i32
    return %c0_i32, %arg0 : i32, i32
  }
  func.func @transform_3(%arg0: i32, %arg1: i32) -> (i32, i32) {
    %c0_i32 = arith.constant 0 : i32
    %c0_i32_0 = arith.constant 0 : i32
    return %c0_i32, %arg0 : i32, i32
  }
}

</mosaic_0001>

<bundles_post_ra>
// kernel: mlp_forward.5
= control target key start
LH: loop header
LB: loop body
LE: loop exit
PB: predicated region body
PF: predicated region fallthrough
CT: control target
= control target key end

     0   :  { %v203_v0 = vmov 0.0   ;;  %vm204_vm0 = vmmov 0   ;;  %s264_s1 = inlined_call_operand.vmem [shape: bf16[128,128], index: 1, kind: input, shape index: {}]   ;;  %s265_s0 = inlined_call_operand.vmem [shape: f32[16,128], index: 0, kind: input, shape index: {}]   ;;  %s266_s2 = inlined_call_operand.vmem [shape: f32[1,128], index: 2, kind: input, shape index: {}]   ;;  %s267_s3 = inlined_call_operand.vmem [shape: f32[16,128], index: 3, kind: output, shape index: {}]  }
   0x1   :  { %173 = vmatprep.subr.bf16.mxu0 %v203_v0  ;;  %v195_v1 = vld [vmem:[%s264_s1 + $0x38] sm:$0xff]   ;;  %189 = vmatprep.mubr.msk.bf16.mxu0 %vm204_vm0, %v203_v0  ;;  %v196_v2 = vld [vmem:[%s264_s1 + $0x30] sm:$0xff]   ;;  %v197_v3 = vld [vmem:[%s264_s1 + $0x28] sm:$0xff]  }
   0x2   :  { %174 = vmatpush3.bf16.msra.mxu0 %v195_v1  ;;  %v198_v4 = vld [vmem:[%s264_s1 + $0x20] sm:$0xff]   ;;  %v199_v5 = vld [vmem:[%s264_s1 + $0x18] sm:$0xff]   ;;  %v200_v6 = vld [vmem:[%s264_s1 + $0x10] sm:$0xff]  }
   0x3   :  { %175 = vmatprep.subr.bf16.mxu0 %v203_v0  ;;  %v201_v7 = vld [vmem:[%s264_s1 + $0x8] sm:$0xff]   ;;  %v202_v8 = vld [vmem:[%s264_s1] sm:$0xff]  }
   0x4   :  { %v21_v9 = vld [vmem:[%s265_s0] sm:$0xff]  ;;  %v22_v10 = vld [vmem:[%s265_s0 + $0x8] sm:$0xff] }
   0x5   :  { %v23_v11 = vpack.c.bf16 %v22_v10, %v21_v9  ;;  %v163_v12 = vld [vmem:[%s266_s2] ss:$0 sm:$0xff] }
   0x6   :  { %176 = vmatpush3.bf16.msra.mxu0 %v196_v2 }
   0x7   :  { %177 = vmatprep.subr.bf16.mxu0 %v203_v0 }
   0xa   :  { %178 = vmatpush3.bf16.msra.mxu0 %v197_v3 }
   0xb   :  { %179 = vmatprep.subr.bf16.mxu0 %v203_v0 }
   0xe   :  { %180 = vmatpush3.bf16.msra.mxu0 %v198_v4 }
   0xf   :  { %181 = vmatprep.subr.bf16.mxu0 %v203_v0 }
  0x12   :  { %182 = vmatpush3.bf16.msra.mxu0 %v199_v5 }
  0x13   :  { %183 = vmatprep.subr.bf16.mxu0 %v203_v0 }
  0x16   :  { %184 = vmatpush3.bf16.msra.mxu0 %v200_v6 }
  0x17   :  { %185 = vmatprep.subr.bf16.mxu0 %v203_v0 }
  0x1a   :  { %186 = vmatpush3.bf16.msra.mxu0 %v201_v7 }
  0x1b   :  { %187 = vmatprep.subr.bf16.mxu0 %v203_v0 }
  0x1e   :  { %188 = vmatpush3.bf16.msra.mxu0 %v202_v8 }
  0x21   :  { %190 = vmatmul.mubr.bf16.vlgmr.msra.gmra.mxu0 %v23_v11 }
  0xe1   :  { %v124_v13 = vpop.f32.mrf.mxu0 }
  0xe2   :  { %v147_v14 = vadd.f32 %v163_v12, %v124_v13 }
  0xe3   :  { %v191_v15 = vpop.f32.mrf.mxu0 }
  0xe4   :  { %149 = vst [vmem:[%s267_s3] sm:$0xff] %v147_v14 }
  0xe5   :  { %v127_v16 = vpop.f32.mrf.mxu0 }
  0xe6   :  { %v148_v17 = vadd.f32 %v163_v12, %v127_v16 }
  0xe7   :  { %v192_v18 = vpop.f32.mrf.mxu0 }
  0xe8   :  { %150 = vst [vmem:[%s267_s3 + $0x8] sm:$0xff] %v148_v17 }

// kernel: mlp_forward.3
= control target key start
LH: loop header
LB: loop body
LE: loop exit
PB: predicated region body
PF: predicated region fallthrough
CT: control target
= control target key end

     0   :  { %v267_v0 = vmov 0.0   ;;  %vm268_vm0 = vmmov 0   ;;  %v155_v12 = vlaneseq  ;;  %s347_s1 = inlined_call_operand.vmem [shape: bf16[128,128], index: 1, kind: input, shape index: {}]   ;;  %s348_s0 = inlined_call_operand.vmem [shape: f32[16,128], index: 0, kind: input, shape index: {}]   ;;  %s349_s2 = inlined_call_operand.vmem [shape: f32[1,128], index: 2, kind: input, shape index: {}]   ;;  %s350_s3 = inlined_call_operand.vmem [shape: f32[1,128], index: 3, kind: input, shape index: {}]   ;;  %s351_s4 = inlined_call_operand.vmem [shape: f32[1,128], index: 4, kind: input, shape index: {}]   ;;  %s352_s5 = inlined_call_operand.vmem [shape: f32[16,128], index: 5, kind: output, shape index: {}]  }
   0x1   :  { %235 = vmatprep.subr.bf16.mxu0 %v267_v0  ;;  %v257_v1 = vld [vmem:[%s347_s1 + $0x38] sm:$0xff]   ;;  %251 = vmatprep.mubr.msk.bf16.mxu0 %vm268_vm0, %v267_v0  ;;  %v258_v2 = vld [vmem:[%s347_s1 + $0x30] sm:$0xff]   ;;  %v259_v3 = vld [vmem:[%s347_s1 + $0x28] sm:$0xff]  }
   0x2   :  { %236 = vmatpush3.bf16.msra.mxu0 %v257_v1  ;;  %v260_v4 = vld [vmem:[%s347_s1 + $0x20] sm:$0xff]   ;;  %v261_v5 = vld [vmem:[%s347_s1 + $0x18] sm:$0xff]   ;;  %v262_v6 = vld [vmem:[%s347_s1 + $0x10] sm:$0xff]   ;;  %v156_v13 = vshrl.u32 %v155_v12, 7 }
   0x3   :  { %237 = vmatprep.subr.bf16.mxu0 %v267_v0  ;;  %v263_v7 = vld [vmem:[%s347_s1 + $0x8] sm:$0xff]   ;;  %v264_v8 = vld [vmem:[%s347_s1] sm:$0xff]  }
   0x4   :  { %v27_v9 = vld [vmem:[%s348_s0] sm:$0xff]  ;;  %v28_v10 = vld [vmem:[%s348_s0 + $0x8] sm:$0xff]  ;;  %v157_v15 = vadd.s32 8, %v156_v13  ;;  %v194_v46 = vsub.s32 0, %v156_v13 }
   0x5   :  { %v29_v11 = vpack.c.bf16 %v28_v10, %v27_v9  ;;  %v225_v17 = vld [vmem:[%s349_s2] ss:$0 sm:$0xff] }
   0x6   :  { %238 = vmatpush3.bf16.msra.mxu0 %v258_v2  ;;  %vm159_vm1 = vcmp.lt.s32.totalorder %v157_v15, 12  ;;  %v184_v45 = vld [vmem:[%s350_s3] sm:$0x1] }
   0x7   :  { %239 = vmatprep.subr.bf16.mxu0 %v267_v0  ;;  %v188_v49 = vld [vmem:[%s351_s4] sm:$0x1] }
   0xa   :  { %240 = vmatpush3.bf16.msra.mxu0 %v259_v3 }
   0xb   :  { %241 = vmatprep.subr.bf16.mxu0 %v267_v0 }
   0xe   :  { %242 = vmatpush3.bf16.msra.mxu0 %v260_v4 }
   0xf   :  { %243 = vmatprep.subr.bf16.mxu0 %v267_v0 }
  0x12   :  { %244 = vmatpush3.bf16.msra.mxu0 %v261_v5 }
  0x13   :  { %245 = vmatprep.subr.bf16.mxu0 %v267_v0 }
  0x16   :  { %246 = vmatpush3.bf16.msra.mxu0 %v262_v6 }
  0x17   :  { %247 = vmatprep.subr.bf16.mxu0 %v267_v0 }
  0x1a   :  { %248 = vmatpush3.bf16.msra.mxu0 %v263_v7 }
  0x1b   :  { %249 = vmatprep.subr.bf16.mxu0 %v267_v0 }
  0x1e   :  { %250 = vmatpush3.bf16.msra.mxu0 %v264_v8 }
  0x21   :  { %252 = vmatmul.mubr.bf16.vlgmr.msra.gmra.mxu0 %v29_v11 }
  0xe1   :  { %v130_v14 = vpop.f32.mrf.mxu0 }
  0xe2   :  { %v153_v20 = vadd.f32 %v225_v17, %v130_v14 }
  0xe3   :  { %v253_v16 = vpop.f32.mrf.mxu0 }
  0xe5   :  { %v133_v18 = vpop.f32.mrf.mxu0 }
  0xe6   :  { %v154_v19 = vadd.f32 %v225_v17, %v133_v18 }
  0xe7   :  { %v254_v21 = vpop.f32.mrf.mxu0 }
  0xe8   :  { %v161_v22 = vsel %vm159_vm1, %v154_v19, 0.0 }
  0xe9   :  { %v162_v23 = vadd.f32 %v161_v22, %v153_v20 }
  0xeb   :  { %v163_v24 = vrot.slane %v162_v23, 4 }
  0xed   :  { %v164_v25 = vadd.f32 %v163_v24, %v162_v23 }
  0xef   :  { %v165_v26 = vrot.slane %v164_v25, 2 }
  0xf1   :  { %v166_v27 = vadd.f32 %v165_v26, %v164_v25 }
  0xf3   :  { %v167_v28 = vrot.slane %v166_v27, 1 }
  0xf5   :  { %v168_v29 = vadd.f32 %v167_v28, %v166_v27 }
  0xf7   :  { %v169_v30 = vmul.f32 0.083333336, %v168_v29 }
  0xf9   :  { %v170_v31 = vsub.f32 %v153_v20, %v169_v30  ;;  %v171_v32 = vsub.f32 %v154_v19, %v169_v30 }
  0xfb   :  { %v173_v33 = vsel %vm159_vm1, %v171_v32, 0.0  ;;  %v174_v34 = vmul.f32 %v170_v31, %v170_v31 }
  0xfc   :  { %v175_v35 = vmul.f32 %v173_v33, %v173_v33 }
  0xfe   :  { %v176_v36 = vadd.f32 %v175_v35, %v174_v34 }
 0x100   :  { %v177_v37 = vrot.slane %v176_v36, 4 }
 0x102   :  { %v178_v38 = vadd.f32 %v177_v37, %v176_v36 }
 0x104   :  { %v179_v39 = vrot.slane %v178_v38, 2 }
 0x106   :  { %v180_v40 = vadd.f32 %v179_v39, %v178_v38 }
 0x108   :  { %v181_v41 = vrot.slane %v180_v40, 1 }
 0x10a   :  { %v182_v42 = vadd.f32 %v181_v41, %v180_v40 }
 0x10c   :  { %v183_v43 = vmul.f32 0.083333336, %v182_v42 }
 0x10e   :  { %v185_v44 = vadd.f32 1e-05, %v183_v43 }
 0x110   :  { %265 = vrsqrt.f32 %v185_v44 }
 0x11d   :  { %v266_v47 = vpop.eup %265 }
 0x11e   :  { %v187_v48 = vmul.f32 %v266_v47, %v184_v45 }
 0x120   :  { %v189_v50 = vmul.f32 %v187_v48, %v169_v30  ;;  %v195_v51 = vrot.slane %v187_v48, %v194_v46 }
 0x122   :  { %v190_v52 = vsub.f32 %v188_v49, %v189_v50  ;;  %v197_v53 = vmul.f32 %v195_v51, %v153_v20  ;;  %v198_v54 = vmul.f32 %v195_v51, %v154_v19 }
 0x124   :  { %v203_v55 = vrot.slane %v190_v52, %v194_v46 }
 0x126   :  { %v205_v56 = vadd.f32 %v203_v55, %v197_v53  ;;  %v206_v57 = vadd.f32 %v203_v55, %v198_v54 }
 0x128   :  { %v207_v58 = vmax.f32 %v205_v56, 0.0  ;;  %v208_v59 = vmax.f32 %v206_v57, 0.0 }
 0x12a   :  { %v210_v60 = vsel %vm159_vm1, %v208_v59, 0.0  ;;  %211 = vst [vmem:[%s352_s5] sm:$0xff] %v207_v58 }
 0x12b   :  { %212 = vst [vmem:[%s352_s5 + $0x8] sm:$0xff] %v210_v60 }

</bundles_post_ra>
